<compile_context>
chip_gen: v7x
topology: tpu7x:2x2x1
jax: 0.10.0
libtpu: 0.0.40
codegen_flags: <defaults>
</compile_context>

<pallas_src>
import math

import jax
import jax.numpy as jnp
from jax.experimental import pallas as pl
from jax.experimental.pallas import tpu as pltpu


def _gelu_new(x):
    # "gelu_new" (tanh approximation), matching HF ACT2FN["gelu_new"] used by Phi.
    c = math.sqrt(2.0 / math.pi)
    return 0.5 * x * (1.0 + jnp.tanh(c * (x + 0.044715 * (x * x * x))))


def _round_up(x, m):
    return (x + m - 1) // m * m


def _tpu_vmem_capacity_bytes():
    try:
        return int(pltpu.get_tpu_info().vmem_capacity_bytes)
    except Exception:
        return 64 * 1024 * 1024  # conservative: v7x per-TC VMEM


def phi_mlp_kernel(x_ref, w1_ref, b1_ref, w2_ref, b2_ref, o_ref, acc_ref):
    j = pl.program_id(1)

    @pl.when(j == 0)
    def _init():
        # Seed the f32 accumulator with the fc2 bias (added exactly once).
        acc_ref[...] = jnp.broadcast_to(
            b2_ref[...].astype(jnp.float32), acc_ref.shape)

    # fc1 partial: (tm, H) @ (H, ti) -> f32 on the MXU, then bias + gelu_new
    # in f32 (VPU mul / EUP tanh, hidden under MXU work on every generation).
    h = jnp.dot(x_ref[...], w1_ref[...], preferred_element_type=jnp.float32)
    h = h + b1_ref[...].astype(jnp.float32)
    h = _gelu_new(h)

    # fc2 partial sum over this intermediate tile: (tm, ti) @ (ti, H).
    acc_ref[...] += jnp.dot(h.astype(w2_ref.dtype), w2_ref[...],
                            preferred_element_type=jnp.float32)

    @pl.when(j == pl.num_programs(1) - 1)
    def _finalize():
        o_ref[...] = acc_ref[...].astype(o_ref.dtype)


def phi_mlp(hidden_states, w1, b1, w2, b2, *, tile_m=512, tile_i=512,
            compute_dtype=jnp.bfloat16):
    """hidden_states: (B, S, H); w1: (H, I); b1: (I,); w2: (I, H); b2: (H,).

    Weights are stored pre-transposed (in_features, out_features) so both
    matmuls are lane-dense.  Matmul operands are cast to `compute_dtype`
    (default bf16, MXU-native); accumulation stays f32.
    """
    B, S, H = hidden_states.shape
    Hw, I = w1.shape
    assert Hw == H and w2.shape == (I, H) and b1.shape == (I,) and b2.shape == (H,)
    M = B * S
    out_dtype = hidden_states.dtype

    compute_dtype = jnp.dtype(compute_dtype)
    cbytes = compute_dtype.itemsize
    row_align = 16 if cbytes < 4 else 8

    # ---- intermediate (I) tiling: exact divisor, else zero-pad I ------------
    if I <= tile_i:
        ti, I_pad = I, I
    else:
        ti_cap = max(128, (tile_i // 128) * 128)
        ti = 0
        for cand in range(ti_cap, 0, -128):
            if I % cand == 0:
                ti = cand
                break
        if ti:
            I_pad = I
        else:
            # No multiple-of-128 divisor of I: zero-pad instead of ti = I
            # (bounded VMEM; gelu_new(0) == 0 so padding is numerically exact).
            ti = ti_cap
            I_pad = _round_up(I, ti)

    # ---- row (M) tiling ------------------------------------------------------
    M_align = _round_up(M, row_align)
    tm = _round_up(min(tile_m, M_align), row_align)
    # Give the "parallel" row axis >= 2 iterations when possible, so v7x's
    # second TensorCore (and v6e megacore) is not idle for small M.
    if tm >= M_align and M_align >= 2 * row_align:
        tm = _round_up((M_align + 1) // 2, row_align)

    # ---- generation-aware VMEM budget & buffering depth ----------------------
    vmem_cap = _tpu_vmem_capacity_bytes()
    vmem_budget = max(vmem_cap - 16 * 1024 * 1024, 24 * 1024 * 1024)
    # Deeper weight buffering on big-VMEM parts (v5e/v6e) to hide DMA jitter.
    weight_bufs = 3 if (vmem_cap >= 100 * 1024 * 1024 and I_pad // ti >= 3) else 2

    out_bytes = jnp.dtype(out_dtype).itemsize

    def vmem_est(tm_):
        return int(1.2 * (
            2 * tm_ * H * cbytes                          # x tile (double buffered)
            + weight_bufs * (H * ti + ti * H) * cbytes    # W1 + W2 tiles
            + 2 * (ti + H) * 4                            # f32 bias tiles
            + 2 * tm_ * H * out_bytes                     # output tile
            + tm_ * H * 4))                               # f32 accumulator

    while vmem_est(tm) > vmem_budget and tm > row_align:
        tm = max(row_align, _round_up(tm // 2, row_align))

    M_pad = _round_up(M, tm)
    grid = (M_pad // tm, I_pad // ti)

    # ---- operand preparation -------------------------------------------------
    x2d = hidden_states.reshape(M, H).astype(compute_dtype)
    if M_pad != M:
        x2d = jnp.pad(x2d, ((0, M_pad - M), (0, 0)))
    w1c = w1.astype(compute_dtype)
    w2c = w2.astype(compute_dtype)
    b1p = b1
    if I_pad != I:
        w1c = jnp.pad(w1c, ((0, 0), (0, I_pad - I)))
        w2c = jnp.pad(w2c, ((0, I_pad - I), (0, 0)))
        b1p = jnp.pad(b1, ((0, I_pad - I),))
    b1_2d = b1p.reshape(1, I_pad).astype(jnp.float32)   # biases stay f32
    b2_2d = b2.reshape(1, H).astype(jnp.float32)

    # ---- advisory cost estimate ----------------------------------------------
    flops = 4 * M_pad * H * I_pad                       # two matmuls
    transcendentals = M_pad * I_pad                     # one tanh per activation
    weight_bytes = (w1c.size + w2c.size) * cbytes
    bytes_accessed = (
        M_pad * H * cbytes                              # x
        + grid[0] * weight_bytes                        # W1/W2 re-streamed per row tile
        + (b1_2d.size + b2_2d.size) * 4                 # biases
        + M_pad * H * out_bytes)                        # out
    cost = pl.CostEstimate(flops=flops, transcendentals=transcendentals,
                           bytes_accessed=bytes_accessed)

    # ---- block specs ----------------------------------------------------------
    if weight_bufs != 2:
        w1_spec = pl.BlockSpec((H, ti), lambda i, j: (0, j),
                               pipeline_mode=pl.Buffered(weight_bufs))
        w2_spec = pl.BlockSpec((ti, H), lambda i, j: (j, 0),
                               pipeline_mode=pl.Buffered(weight_bufs))
    else:
        w1_spec = pl.BlockSpec((H, ti), lambda i, j: (0, j))
        w2_spec = pl.BlockSpec((ti, H), lambda i, j: (j, 0))

    out2d = pl.pallas_call(
        phi_mlp_kernel,
        out_shape=jax.ShapeDtypeStruct((M_pad, H), out_dtype),
        grid_spec=pltpu.PrefetchScalarGridSpec(
            num_scalar_prefetch=0,
            grid=grid,
            in_specs=[
                pl.BlockSpec((tm, H), lambda i, j: (i, 0)),   # x row tile
                w1_spec,                                      # W1 tile
                pl.BlockSpec((1, ti), lambda i, j: (0, j)),   # b1 tile
                w2_spec,                                      # W2 tile
                pl.BlockSpec((1, H), lambda i, j: (0, 0)),    # b2 (tiny, resident)
            ],
            out_specs=pl.BlockSpec((tm, H), lambda i, j: (i, 0)),  # const over j
            scratch_shapes=[pltpu.VMEM((tm, H), jnp.float32)],     # accumulator
        ),
        compiler_params=pltpu.CompilerParams(
            dimension_semantics=("parallel", "arbitrary"),
            vmem_limit_bytes=int(vmem_budget),
        ),
        cost_estimate=cost,
    )(x2d, w1c, b1_2d, w2c, b2_2d)

    if M_pad != M:
        out2d = out2d[:M]
    return out2d.reshape(B, S, H)


def phi_mlp_ref(hidden_states, w1, b1, w2, b2):
    h = jnp.dot(hidden_states, w1) + b1
    h = _gelu_new(h)
    return jnp.dot(h, w2) + b2


if __name__ == "__main__":
    # Small config consistent with PhiMLP: hidden_size=32, intermediate_size=128,
    # hidden_act="gelu_new"; input (batch=2, seq=8, hidden=32).
    batch, seq, hidden, intermediate = 2, 8, 32, 128

    key = jax.random.PRNGKey(0)
    kx, kw1, kb1, kw2, kb2 = jax.random.split(key, 5)

    x = jax.random.normal(kx, (batch, seq, hidden), dtype=jnp.float32)

    # Deterministic parameter init (nn.Linear-like uniform fan-in scaling),
    # stored pre-transposed as (in_features, out_features).
    lim1 = 1.0 / math.sqrt(hidden)
    lim2 = 1.0 / math.sqrt(intermediate)
    w1 = jax.random.uniform(kw1, (hidden, intermediate), jnp.float32, -lim1, lim1)
    b1 = jax.random.uniform(kb1, (intermediate,), jnp.float32, -lim1, lim1)
    w2 = jax.random.uniform(kw2, (intermediate, hidden), jnp.float32, -lim2, lim2)
    b2 = jax.random.uniform(kb2, (hidden,), jnp.float32, -lim2, lim2)

    ref = phi_mlp_ref(x, w1, b1, w2, b2)

    # f32 compute path: tight check against the f32 reference.
    out_f32 = jax.block_until_ready(
        phi_mlp(x, w1, b1, w2, b2, compute_dtype=jnp.float32))
    assert out_f32.shape == (batch, seq, hidden)
    assert jnp.allclose(out_f32, ref, atol=1e-5, rtol=1e-5), "f32 mismatch vs reference"

    # bf16 compute path (production default, MXU-native): loose check.
    out_bf16 = jax.block_until_ready(
        phi_mlp(x, w1, b1, w2, b2, compute_dtype=jnp.bfloat16))
    assert out_bf16.shape == (batch, seq, hidden)
    assert out_bf16.dtype == x.dtype
    assert jnp.allclose(out_bf16, ref, atol=3e-2, rtol=3e-2), "bf16 mismatch vs reference"

    print("KERNEL_OK")
</pallas_src>

<mosaic_0001>
module attributes {stable_mosaic.version = 11 : i64} {
  func.func @phi_mlp_kernel(%arg0: i32, %arg1: i32, %arg2: memref<8x32xf32, #tpu.memory_space<vmem>>, %arg3: memref<32x128xf32, #tpu.memory_space<vmem>>, %arg4: memref<1x128xf32, #tpu.memory_space<vmem>>, %arg5: memref<128x32xf32, #tpu.memory_space<vmem>>, %arg6: memref<1x32xf32, #tpu.memory_space<vmem>>, %arg7: memref<8x32xf32, #tpu.memory_space<vmem>>, %arg8: memref<8x32xf32, #tpu.memory_space<vmem>>) attributes {dimension_semantics = [#tpu.dimension_semantics<parallel>, #tpu.dimension_semantics<arbitrary>], iteration_bounds = array<i64: 2, 1>, scalar_prefetch = 0 : i64, scratch_operands = 1 : i64, tpu.core_type = #tpu.core_type<tc>, window_params = [{transform_indices = @transform_0, window_bounds = array<i64: 8, 32>}, {transform_indices = @transform_1, window_bounds = array<i64: 32, 128>}, {transform_indices = @transform_2, window_bounds = array<i64: 1, 128>}, {transform_indices = @transform_3, window_bounds = array<i64: 128, 32>}, {pipeline_mode = #tpu.pipeline_mode<synchronous>, transform_indices = @transform_4, window_bounds = array<i64: 1, 32>}, {transform_indices = @transform_5, window_bounds = array<i64: 8, 32>}]} {
    %c0_i32 = arith.constant 0 : i32
    %0 = arith.cmpi eq, %arg1, %c0_i32 : i32
    %1 = arith.extui %0 : i1 to i32
    %c0_i32_0 = arith.constant 0 : i32
    %2 = arith.cmpi ne, %1, %c0_i32_0 : i32
    scf.if %2 {
      %c0_19 = arith.constant 0 : index
      %c0_20 = arith.constant 0 : index
      %30 = vector.load %arg6[%c0_19, %c0_20] : memref<1x32xf32, #tpu.memory_space<vmem>>, vector<1x32xf32>
      %31 = vector.shape_cast %30 : vector<1x32xf32> to vector<1x32xf32>
      %32 = vector.broadcast %31 : vector<1x32xf32> to vector<8x32xf32>
      %c0_21 = arith.constant 0 : index
      %c0_22 = arith.constant 0 : index
      %33 = vector.load %arg8[%c0_21, %c0_22] : memref<8x32xf32, #tpu.memory_space<vmem>>, vector<8x32xf32>
      tpu.vector_store %arg8[%c0_21, %c0_22], %32 {strides = array<i32>} : memref<8x32xf32, #tpu.memory_space<vmem>>, vector<8x32xf32>,
    } else {
    }
    %c0 = arith.constant 0 : index
    %c0_1 = arith.constant 0 : index
    %3 = vector.load %arg2[%c0, %c0_1] : memref<8x32xf32, #tpu.memory_space<vmem>>, vector<8x32xf32>
    %c0_2 = arith.constant 0 : index
    %c0_3 = arith.constant 0 : index
    %4 = vector.load %arg3[%c0_2, %c0_3] : memref<32x128xf32, #tpu.memory_space<vmem>>, vector<32x128xf32>
    %cst = arith.constant dense<0.000000e+00> : vector<8x128xf32>
    %5 = tpu.matmul %3, %4, %cst {dimension_numbers = #tpu.dot_dimension_numbers<[1], [0], [0], [1], [0, 0, 1, 1], [], []>} : vector<8x32xf32>, vector<32x128xf32>, vector<8x128xf32> -> vector<8x128xf32>
    %c0_4 = arith.constant 0 : index
    %c0_5 = arith.constant 0 : index
    %6 = vector.load %arg4[%c0_4, %c0_5] : memref<1x128xf32, #tpu.memory_space<vmem>>, vector<1x128xf32>
    %7 = vector.broadcast %6 : vector<1x128xf32> to vector<8x128xf32>
    %8 = arith.addf %5, %7 : vector<8x128xf32>
    %cst_6 = arith.constant 5.000000e-01 : f32
    %9 = vector.broadcast %cst_6 : f32 to vector<8x128xf32>
    %10 = arith.mulf %9, %8 : vector<8x128xf32>
    %11 = arith.mulf %8, %8 : vector<8x128xf32>
    %12 = arith.mulf %11, %8 : vector<8x128xf32>
    %cst_7 = arith.constant 4.471500e-02 : f32
    %13 = vector.broadcast %cst_7 : f32 to vector<8x128xf32>
    %14 = arith.mulf %13, %12 : vector<8x128xf32>
    %15 = arith.addf %8, %14 : vector<8x128xf32>
    %cst_8 = arith.constant 0.797884583 : f32
    %16 = vector.broadcast %cst_8 : f32 to vector<8x128xf32>
    %17 = arith.mulf %16, %15 : vector<8x128xf32>
    %18 = math.tanh %17 : vector<8x128xf32>
    %cst_9 = arith.constant 1.000000e+00 : f32
    %19 = vector.broadcast %cst_9 : f32 to vector<8x128xf32>
    %20 = arith.addf %19, %18 : vector<8x128xf32>
    %21 = arith.mulf %10, %20 : vector<8x128xf32>
    %c0_10 = arith.constant 0 : index
    %c0_11 = arith.constant 0 : index
    %22 = vector.load %arg8[%c0_10, %c0_11] : memref<8x32xf32, #tpu.memory_space<vmem>>, vector<8x32xf32>
    %c0_12 = arith.constant 0 : index
    %c0_13 = arith.constant 0 : index
    %23 = vector.load %arg5[%c0_12, %c0_13] : memref<128x32xf32, #tpu.memory_space<vmem>>, vector<128x32xf32>
    %cst_14 = arith.constant dense<0.000000e+00> : vector<8x32xf32>
    %24 = tpu.matmul %21, %23, %cst_14 {dimension_numbers = #tpu.dot_dimension_numbers<[1], [0], [0], [1], [0, 0, 1, 1], [], []>} : vector<8x128xf32>, vector<128x32xf32>, vector<8x32xf32> -> vector<8x32xf32>
    %25 = arith.addf %22, %24 : vector<8x32xf32>
    %c0_15 = arith.constant 0 : index
    %c0_16 = arith.constant 0 : index
    %26 = vector.load %arg8[%c0_15, %c0_16] : memref<8x32xf32, #tpu.memory_space<vmem>>, vector<8x32xf32>
    tpu.vector_store %arg8[%c0_15, %c0_16], %25 {strides = array<i32>} : memref<8x32xf32, #tpu.memory_space<vmem>>, vector<8x32xf32>,
    %c0_i32_17 = arith.constant 0 : i32
    %27 = arith.cmpi eq, %arg1, %c0_i32_17 : i32
    %28 = arith.extui %27 : i1 to i32
    %c0_i32_18 = arith.constant 0 : i32
    %29 = arith.cmpi ne, %28, %c0_i32_18 : i32
    scf.if %29 {
      %c0_19 = arith.constant 0 : index
      %c0_20 = arith.constant 0 : index
      %30 = vector.load %arg8[%c0_19, %c0_20] : memref<8x32xf32, #tpu.memory_space<vmem>>, vector<8x32xf32>
      %c0_21 = arith.constant 0 : index
      %c0_22 = arith.constant 0 : index
      %31 = vector.load %arg7[%c0_21, %c0_22] : memref<8x32xf32, #tpu.memory_space<vmem>>, vector<8x32xf32>
      tpu.vector_store %arg7[%c0_21, %c0_22], %30 {strides = array<i32>} : memref<8x32xf32, #tpu.memory_space<vmem>>, vector<8x32xf32>,
    } else {
    }
    return
  }
  func.func @transform_0(%arg0: i32, %arg1: i32) -> (i32, i32) {
    %c0_i32 = arith.constant 0 : i32
    %c0_i32_0 = arith.constant 0 : i32
    return %arg0, %c0_i32 : i32, i32
  }
  func.func @transform_1(%arg0: i32, %arg1: i32) -> (i32, i32) {
    %c0_i32 = arith.constant 0 : i32
    %c0_i32_0 = arith.constant 0 : i32
    return %c0_i32, %arg1 : i32, i32
  }
  func.func @transform_2(%arg0: i32, %arg1: i32) -> (i32, i32) {
    %c0_i32 = arith.constant 0 : i32
    %c0_i32_0 = arith.constant 0 : i32
    return %c0_i32, %arg1 : i32, i32
  }
  func.func @transform_3(%arg0: i32, %arg1: i32) -> (i32, i32) {
    %c0_i32 = arith.constant 0 : i32
    %c0_i32_0 = arith.constant 0 : i32
    return %arg1, %c0_i32 : i32, i32
  }
  func.func @transform_4(%arg0: i32, %arg1: i32) -> (i32, i32) {
    %c0_i32 = arith.constant 0 : i32
    %c0_i32_0 = arith.constant 0 : i32
    %c0_i32_1 = arith.constant 0 : i32
    return %c0_i32, %c0_i32_0 : i32, i32
  }
  func.func @transform_5(%arg0: i32, %arg1: i32) -> (i32, i32) {
    %c0_i32 = arith.constant 0 : i32
    %c0_i32_0 = arith.constant 0 : i32
    return %arg0, %c0_i32 : i32, i32
  }
}

</mosaic_0001>

<bundles_post_ra>
// kernel: tpu_custom_call.1
= control target key start
LH: loop header
LB: loop body
LE: loop exit
PB: predicated region body
PF: predicated region fallthrough
CT: control target
= control target key end

     0   :  { %10 = vsyncpa [#allocation4], 0  ;;  %s1081_s0 = inlined_call_operand.vmem [shape: f32[16,32], index: 0, kind: input, shape index: {}]   ;;  %s1082_s1 = inlined_call_operand.vmem [shape: f32[32,128], index: 1, kind: input, shape index: {}]   ;;  %s1083_s2 = inlined_call_operand.vmem [shape: f32[1,128], index: 2, kind: input, shape index: {}]   ;;  %s1084_s3 = inlined_call_operand.vmem [shape: f32[128,32], index: 3, kind: input, shape index: {}]   ;;  %s1085_s4 = inlined_call_operand.vmem [shape: f32[1,32], index: 4, kind: input, shape index: {}]   ;;  %s1086_s5 = inlined_call_operand.hbm [shape: f32[16,32], index: 5, kind: output, shape index: {}]  }
   0x1   :  { %12 = vsyncpa [#allocation4 + $0x1], 0  ;;  %s899_s18 = smov 0   ;;  %s901_s19 = smov 0  }
   0x2   :  { %s903_s20 = smov 0   ;;  %s905_s21 = smov 0  }
   0x3   :  { %s907_s22 = smov 0   ;;  %s909_s23 = smov 0  }
   0x4 LB: > { %s610_s24 = sadd.s32 4294967295, %s863_s23   ;;  %s611_s25 = sadd.s32 4294967294, %s863_s23   ;;  %s863_s23 = sphi %s909_s23, %s18_s23   ;;  %s859_s22 = sphi %s907_s22, %s1093_s22   ;;  %s855_s21 = sphi %s905_s21, %s1092_s21   ;;  %s851_s20 = sphi %s903_s20, %s1091_s20   ;;  %s847_s19 = sphi %s901_s19, %s1090_s19   ;;  %s843_s18 = sphi %s899_s18, %s1089_s18  }
   0x5   : > { %s30_s26 = sadd.s32 1, %s859_s22  ;;  %s162_s27 = sadd.s32 1, %s851_s20 }
   0x6   : > { %p32_p0 = scmp.ge.s32.totalorder %s30_s26, 2  ;;  %p172_p1 = scmp.ne.s32.totalorder %s851_s20, %s847_s19 }
   0x7   : > { %p173_p2 = scmp.eq.s32.totalorder %s610_s24, 1  ;;  %p178_p3 = scmp.ne.s32.totalorder %s847_s19, %s843_s18 }
   0x8   : > { %s1095_s26 = smov (%p32_p0, %s30_s26), 0  ;;  %p179_p5 = scmp.eq.s32.totalorder %s611_s25, 1 }
   0x9   : > { %p939_p4 = por %p173_p2, %p172_p1  ;;  %s159_s29 = ssub.s32 %s859_s22, %s1095_s26 }
   0xa   : > { %p617_p6 = scmp.ge.s32.totalorder %s863_s23, 1  ;;  %p160_p7 = scmp.eq.s32.totalorder %s159_s29, 0 }
   0xb   : > { %p946_p8 = por %p179_p5, %p178_p3  ;;  %p229_p9 = scmp.lt.s32.totalorder %s863_s23, 3 }
   0xc   : > { %s952_s6 = scalar_select %p160_p7, %s851_s20, %s162_s27  }
   0xd   : > { %p230_p10 = pnand %p617_p6, %p229_p9 }
   0xe   : > { %v299_v0 = vld [vmem:[%s1082_s1] sm:$0xff] (!%p230_p10)  ;;  %v300_v1 = vld [vmem:[%s1082_s1 + $0x8] sm:$0xff] (!%p230_p10)  ;;  %v301_v2 = vld [vmem:[%s1082_s1 + $0x10] sm:$0xff] (!%p230_p10)  ;;  %v865_v3 = vmov (!%p230_p10), 0.0|0.0   ;;  %vm866_vm0 = vmmov (!%p230_p10), 0   ;;  %v867_v6 = vmov (!%p230_p10), 0.0  }
   0xf   : > { %233 = sbr.rel (%p230_p10) target bundleno = 502 (0x1f6), region = 40  ;;  %695 = vmatprep.subr.bf16.mxu0 (!%p230_p10), %v865_v3  ;;  %v696_v4 = vpack.c.bf16 (!%p230_p10), %v300_v1, %v299_v0  ;;  %v302_v5 = vld [vmem:[%s1082_s1 + $0x18] sm:$0xff] (!%p230_p10)  ;;  %657 = vmatprep.mubr.msk.f32.mxu0 (!%p230_p10), %vm866_vm0, %v867_v6  ;;  %p268_p11 = scmp.lt.s32.totalorder (!%p230_p10), %s855_s21, 1  ;;  %v620_v7 = vld [vmem:[%s1085_s4] ss:$0 sm:$0xff] (!%p230_p10)  ;;  %vm296_vm1 = vcmask (!%p230_p10), 261120  }
  0x10   : > { %v394_v8 = vld [vmem:[%s1084_s3] sm:$0xff] (!%p230_p10)  ;;  %297 = vst.msk [vmem:[#allocation2] sm:$0xff] (!%p230_p10), %vm296_vm1, %v620_v7  ;;  %701 = vmatprep.subr.bf16.mxu1 (!%p230_p10), %v865_v3  ;;  %v395_v9 = vld [vmem:[%s1084_s3 + $0x8] sm:$0xff] (!%p230_p10)  ;;  %692 = vmatprep.mubr.msk.f32.mxu1 (!%p230_p10), %vm866_vm0, %v867_v6  ;;  %v699_v10 = vpack.c.bf16 (!%p230_p10), %v302_v5, %v301_v2  ;;  %v396_v13 = vld [vmem:[%s1084_s3 + $0x10] sm:$0xff] (!%p230_p10)  ;;  %s265_s11 = sand.u32 (!%p230_p10), 1, %s847_s19   ;;  %s624_s13 = sshll.u32 (!%p230_p10), %s855_s21, 7 }
  0x11   : > { %697 = vmatpush3.bf16.msra.mxu0 (!%p230_p10), %v696_v4  ;;  %v702_v11 = vpack.c.bf16 (!%p230_p10), %v395_v9, %v394_v8  ;;  %v397_v14 = vld [vmem:[%s1084_s3 + $0x18] sm:$0xff] (!%p230_p10)  ;;  %v398_v16 = vld [vmem:[%s1084_s3 + $0x20] sm:$0xff] (!%p230_p10)  ;;  %v399_v17 = vld [vmem:[%s1084_s3 + $0x28] sm:$0xff] (!%p230_p10)  ;;  %s618_s12 = sshll.u32 (!%p230_p10), %s265_s11, 3  ;;  %s1033_s24 = scalar_lea.hbm (!%p230_p10), %s1086_s5, %s624_s13 }
  0x12   : > { %698 = vmatprep.subr.bf16.mxu0 (!%p230_p10), %v865_v3  ;;  %v705_v15 = vpack.c.bf16 (!%p230_p10), %v397_v14, %v396_v13  ;;  %v708_v18 = vpack.c.bf16 (!%p230_p10), %v399_v17, %v398_v16  ;;  %v400_v19 = vld [vmem:[%s1084_s3 + $0x30] sm:$0xff] (!%p230_p10)  ;;  %v401_v20 = vld [vmem:[%s1084_s3 + $0x38] sm:$0xff] (!%p230_p10)  ;;  %v402_v22 = vld [vmem:[%s1084_s3 + $0x40] sm:$0xff] (!%p230_p10)  ;;  %s267_s14 = scalar_lea.vmem (!%p230_p10), [#allocation3], %s618_s12  ;;  %s488_s25 = scalar_lea.sflag (!%p230_p10), [#allocation4], %s265_s11 }
  0x13   : > { %703 = vmatpush3.bf16.msra.mxu1 (!%p230_p10), %v702_v11  ;;  %v711_v21 = vpack.c.bf16 (!%p230_p10), %v401_v20, %v400_v19  ;;  %v403_v23 = vld [vmem:[%s1084_s3 + $0x48] sm:$0xff] (!%p230_p10)  ;;  %v404_v25 = vld [vmem:[%s1084_s3 + $0x50] sm:$0xff] (!%p230_p10)  ;;  %v405_v26 = vld [vmem:[%s1084_s3 + $0x58] sm:$0xff] (!%p230_p10)  ;;  %s501_s15 = sshll.u32 (!%p230_p10), %s267_s14, 4  ;;  %s1035_s15 = int_to_ptr.vmem [resolvable:$true] %s501_s15 }
  0x14   : > { %704 = vmatprep.subr.bf16.mxu1 (!%p230_p10), %v865_v3  ;;  %v714_v24 = vpack.c.bf16 (!%p230_p10), %v403_v23, %v402_v22  ;;  %v717_v27 = vpack.c.bf16 (!%p230_p10), %v405_v26, %v404_v25  ;;  %v406_v28 = vld [vmem:[%s1084_s3 + $0x60] sm:$0xff] (!%p230_p10)  ;;  %v407_v29 = vld [vmem:[%s1084_s3 + $0x68] sm:$0xff] (!%p230_p10)  ;;  %v408_v31 = vld [vmem:[%s1084_s3 + $0x70] sm:$0xff] (!%p230_p10)  ;;  %s785_s27 = scalar_lea.vmem (!%p230_p10), %s1035_s15, 128 }
  0x15   : > { %700 = vmatpush3.bf16.msra.mxu0 (!%p230_p10), %v699_v10  ;;  %v720_v30 = vpack.c.bf16 (!%p230_p10), %v407_v29, %v406_v28  ;;  %v409_v32 = vld [vmem:[%s1084_s3 + $0x78] sm:$0xff] (!%p230_p10)  ;;  %v621_v34 = vld [vmem:[%s1083_s2] ss:$0 sm:$0xff] (!%p230_p10)  ;;  %p786_p12 = scmp.ne.s32.totalorder (!%p230_p10), %s1035_s15, %s785_s27 }
  0x16   : > { %s269_s29 = scalar_select %p268_p11, %s855_s21, 1  ;;  %v723_v33 = vpack.c.bf16 %v409_v32, %v408_v31 }
  0x17   : > { %706 = vmatpush3.bf16.msra.mxu1 %v705_v15  ;;  %v393_v47 = vld [vmem:[#allocation2] sm:$0xff]  ;;  %p787_p13 = pnand %p786_p12, %p939_p4  ;;  %s868_s21 = smov [#allocation3]  }
  0x18   : > { %s619_s7 = sshll.u32 %s269_s29, 3  ;;  %707 = vmatprep.subr.bf16.mxu1 %v865_v3  ;;  %s789_s29 = sshll.u32 %s868_s21, 4  ;;  %s790_s29 = int_to_ptr.vmem [resolvable:$false] %s789_s29 }
  0x19   : > { %s271_s10 = scalar_lea.vmem %s1081_s0, %s619_s7  ;;  %p788_p0 = pneg %p787_p13 }
  0x1a   : > { %v298_v12 = vld [vmem:[%s271_s10] sm:$0xff]  ;;  %s791_s7 = scalar_lea.vmem %s790_s29, 256  ;;  %p792_p1 = scmp.lt.s32.totalorder %s1035_s15, %s790_s29 }
  0x1b   : > { %658 = vmatmul.mubr.msk.f32.vlgmr.msra.gmra.mrb[0].mxu0 %vm296_vm1, %v298_v12  ;;  %709 = vmatpush3.bf16.msra.mxu1 %v708_v18  ;;  %p793_p2 = scmp.lt.s32.totalorder %s791_s7, %s785_s27 }
  0x1c   : > { %710 = vmatprep.subr.bf16.mxu1 %v865_v3 }
  0x1d   : > { %p794_p3 = por %p793_p2, %p792_p1 }
  0x1f   : > { %712 = vmatpush3.bf16.msra.mxu1 %v711_v21  ;;  %p795_p5 = pnand %p794_p3, %p788_p0 }
  0x20   : > { %713 = vmatprep.subr.bf16.mxu1 %v865_v3 }
  0x23   : > { %715 = vmatpush3.bf16.msra.mxu1 %v714_v24 }
  0x24   : > { %716 = vmatprep.subr.bf16.mxu1 %v865_v3 }
  0x27   : > { %718 = vmatpush3.bf16.msra.mxu1 %v717_v27 }
  0x28   : > { %719 = vmatprep.subr.bf16.mxu1 %v865_v3 }
  0x2b   : > { %721 = vmatpush3.bf16.msra.mxu1 %v720_v30 }
  0x2c   : > { %722 = vmatprep.subr.bf16.mxu1 %v865_v3 }
  0x2f   : > { %724 = vmatpush3.bf16.msra.mxu1 %v723_v33 }
  0xee   : > { %v380_v35 = vpop.f32.mrb[0].mxu0 }
  0xef   : > { %v381_v36 = vadd.f32 %v621_v34, %v380_v35  ;;  %v659_v37 = vpop.f32.mrb[1].mxu0 }
  0xf1   : > { %v385_v38 = vmul.f32 %v381_v36, %v381_v36  ;;  %v384_v44 = vmul.f32 0.5, %v381_v36 }
  0xf3   : > { %v386_v39 = vmul.f32 %v385_v38, %v381_v36 }
  0xf5   : > { %v387_v40 = vmul.f32 0.044715, %v386_v39 }
  0xf7   : > { %v388_v41 = vadd.f32 %v387_v40, %v381_v36 }
  0xf9   : > { %v389_v42 = vmul.f32 0.7978846, %v388_v41 }
  0xfb   : > { %783 = vtanh.f32 %v389_v42 }
 0x105   : > { %v784_v43 = vpop.eup %783 }
 0x106   : > { %v391_v45 = vadd.f32 1.0, %v784_v43 }
 0x108   : > { %v392_v46 = vmul.f32 %v391_v45, %v384_v44 }
 0x10a   : > { %693 = vmatmul.mubr.f32.vlgmr.msra.gmra.mrb[0].mxu1 %v392_v46 }
 0x1dd   : > { %v476_v48 = vpop.f32.mrb[0].mxu1 }
 0x1de   : > { %v480_v49 = vadd.f32 %v476_v48, %v393_v47  ;;  %v694_v50 = vpop.f32.mrb[1].mxu1 }
 0x1e0   : > { %481 = vst.msk [vmem:[#allocation2] sm:$0xff] %vm296_vm1, %v480_v49 }
 0x1e7   : > { %v485_v51 = vld [vmem:[#allocation2] sm:$0xff] }
 0x1e8   : > { %486 = vst.msk [vmem:[%s267_s14] sm:$0xff] %vm296_vm1, %v485_v51 }
 0x1e9   : > { %798 = shalt.err (!%p795_p5)
}
 0x1ea   : > { %s799_s8 = scalar_lea.hbm %s1033_s24, 128  ;;  %s803_s11 = scalar_lea.hbm %s1086_s5, 256 }
 0x1eb   : > { %p800_p6 = scmp.ne.s32.totalorder %s1033_s24, %s799_s8  ;;  %p804_p10 = scmp.lt.u32.totalorder %s1033_s24, %s1086_s5 }
 0x1ec   : > { %p805_p11 = scmp.lt.u32.totalorder %s803_s11, %s799_s8  ;;  %p807_p13 = scmp.lt.u32.totalorder %s799_s8, %s1033_s24 }
 0x1ed   : > { %p801_p7 = pnand %p800_p6, %p939_p4 }
 0x1ee   : > { %p806_p12 = por %p805_p11, %p804_p10 }
 0x1ef   : > { %p802_p9 = pneg %p801_p7 }
 0x1f0   : > { %p808_p0 = por %p807_p13, %p806_p12 }
 0x1f2   : > { %p809_p1 = pnand %p808_p0, %p802_p9 }
 0x1f4   : > { %812 = shalt.err (!%p809_p1)
}
 0x1f5   : > { %725 = dma.vmem_to_hbm [thread:$0]  (%p939_p4), %s1035_s15, 128, %s1033_s24, %s488_s25  }
 0x1f6 PF: > { %p731_p2 = scmp.ge.s32.totalorder %s863_s23, 2  ;;  %s513_s14 = sand.u32 1, %s843_s18  }
 0x1f7   : > { %s514_s16 = scalar_lea.sflag [#allocation4], %s513_s14 }
 0x1f8   : > { %p728_p3 = pnand %p731_p2, %p946_p8 }
 0x1fa   : > { %838 = dma.done.wait (!%p728_p3), %s514_s16, 128  }
 0x1fb   : > { %840 = vsyncadd (!%p728_p3), %s514_s16, 4294967168  ;;  %s18_s23 = sadd.s32 1, %s863_s23   ;;  %s1089_s18 = smov %s847_s19 }
 0x1fc   : > { %p15_p5 = scmp.ge.s32.totalorder %s18_s23, 4   ;;  %s1090_s19 = smov %s851_s20 }
 0x1fd   : > { %s1091_s20 = smov %s952_s6  ;;  %s1092_s21 = smov %s859_s22 }
 0x1fe   : > { %s1093_s22 = smov %s1095_s26  ;;  %17 = sbr.rel (!%p15_p5) target bundleno = 4 (0x4), region = 92 }
 0x205   :  { %519 = vsyncpa [#allocation4], 1 }
 0x206   :  { %521 = vsyncpa [#allocation4 + $0x1], 1 }

</bundles_post_ra>
